<compile_context>
chip_gen: v7x
topology: tpu7x:2x2x1
jax: 0.10.0
libtpu: 0.0.40
codegen_flags: <defaults>
</compile_context>

<pallas_src>
import functools

import jax
import jax.numpy as jnp
from jax.experimental import pallas as pl
from jax.experimental.pallas import tpu as pltpu

LANE = 128
SUBLANE = 8
VMEM_LIMIT = 32 * 1024 * 1024  # safe on v5e (128 MiB), v6e (128 MiB), v7x (64 MiB)


def _round_up(x, m):
    return ((x + m - 1) // m) * m


def _pad_to(x, shape):
    pads = [(0, s - d) for d, s in zip(x.shape, shape)]
    if all(p[1] == 0 for p in pads):
        return x
    return jnp.pad(x, pads)


def _pick_tile(size, quantum, max_tile, prefer_multi_step=False):
    """Tile (multiple of `quantum`, <= max_tile) minimizing pad waste."""
    size = max(int(size), 1)
    size_q = _round_up(size, quantum)
    if size_q <= max_tile:
        tile, padded = size_q, size_q
    else:
        tile, padded = quantum, _round_up(size, quantum)
        cand = quantum
        while cand <= max_tile:
            pad = _round_up(size, cand)
            if pad < padded or (pad == padded and cand > tile):
                tile, padded = cand, pad
            cand += quantum
    # v7x has 2 TensorCores: try to keep >= 2 steps on a "parallel" axis.
    if prefer_multi_step and padded // tile < 2:
        half = tile // 2
        if half >= quantum and half % quantum == 0 and padded % half == 0:
            tile = half
    return tile, padded


def _largest_divisor_tile(total, quantum, max_tile):
    """Largest multiple of `quantum` <= max_tile that divides `total`."""
    best = quantum
    cand = quantum
    limit = min(max_tile, total)
    while cand <= limit:
        if total % cand == 0:
            best = cand
        cand += quantum
    return best


# ----------------------------------------------------------------------------
# Kernel 1: h3 = h @ W_lin + b_lin   (nn.Linear), tiled over N rows.
# ----------------------------------------------------------------------------
def _linear_kernel(h_ref, w_ref, b_ref, o_ref):
    o_ref[...] = (
        jnp.dot(h_ref[...], w_ref[...], preferred_element_type=jnp.float32)
        + b_ref[...]
    )


def pallas_linear(h_pad, w_pad, b_pad, tile_n):
    n_pad, f_in_pad = h_pad.shape
    f_out_pad = w_pad.shape[1]
    return pl.pallas_call(
        _linear_kernel,
        out_shape=jax.ShapeDtypeStruct((n_pad, f_out_pad), jnp.float32),
        grid=(n_pad // tile_n,),
        in_specs=[
            pl.BlockSpec((tile_n, f_in_pad), lambda i: (i, 0)),
            pl.BlockSpec((f_in_pad, f_out_pad), lambda i: (0, 0)),
            pl.BlockSpec((1, f_out_pad), lambda i: (0, 0)),
        ],
        out_specs=pl.BlockSpec((tile_n, f_out_pad), lambda i: (i, 0)),
        compiler_params=pltpu.CompilerParams(
            dimension_semantics=("parallel",)),
    )(h_pad, w_pad, b_pad)


# ----------------------------------------------------------------------------
# Kernel 2: fused per-key transform.  Grid = (key, pair-tiles).  bf16 MXU.
#   'multi': prod_i sigmoid(hcat_i @ W_k + b_k) * scale    (scale = ec**t*(1+eps))
#   'sum'  : relu((sum_i hcat_i) @ W_k + b_k)   * scale    (scale = (1+eps))
# Padded pair rows have scale == 0 (and scatter index -1 downstream).
# ----------------------------------------------------------------------------
def _transform_kernel(hcat_ref, w_ref, b_ref, scale_ref, o_ref, *, combination):
    t = hcat_ref.shape[0]                       # static
    w = w_ref[...]                              # (d, f_out) bf16, VMEM-resident
    b = b_ref[...]                              # (1, f_out) f32
    if combination == "multi":
        acc = jax.nn.sigmoid(
            jnp.dot(hcat_ref[0], w, preferred_element_type=jnp.float32) + b)
        for i in range(1, t):
            acc = acc * jax.nn.sigmoid(
                jnp.dot(hcat_ref[i], w, preferred_element_type=jnp.float32) + b)
    else:  # 'sum'
        x = hcat_ref[0]
        for i in range(1, t):
            x = x + hcat_ref[i]
        acc = jax.nn.relu(
            jnp.dot(x, w, preferred_element_type=jnp.float32) + b)
    o_ref[...] = (acc * scale_ref[...]).astype(o_ref.dtype)


def pallas_transform(hcat_all, w_all, b_all, scale_all, tile_p, combination):
    n_keys, t, p_pad, d = hcat_all.shape
    f_out_pad = w_all.shape[2]
    kernel = functools.partial(_transform_kernel, combination=combination)
    return pl.pallas_call(
        kernel,
        out_shape=jax.ShapeDtypeStruct((n_keys, p_pad, f_out_pad), jnp.bfloat16),
        grid=(n_keys, p_pad // tile_p),
        in_specs=[
            pl.BlockSpec((None, t, tile_p, d), lambda k, i: (k, 0, i, 0)),
            pl.BlockSpec((None, d, f_out_pad), lambda k, i: (k, 0, 0)),
            pl.BlockSpec((None, 1, f_out_pad), lambda k, i: (k, 0, 0)),
            pl.BlockSpec((None, tile_p, 1), lambda k, i: (k, i, 0)),
        ],
        out_specs=pl.BlockSpec((None, tile_p, f_out_pad),
                               lambda k, i: (k, i, 0)),
        compiler_params=pltpu.CompilerParams(
            dimension_semantics=("parallel", "parallel"),
            vmem_limit_bytes=VMEM_LIMIT),
    )(hcat_all, w_all, b_all, scale_all)


# ----------------------------------------------------------------------------
# Kernel 3: fused scatter-add over ALL keys + node-centrality scaling,
# accumulated in place into h3 (input_output_aliases).
#   grid = (N tiles [parallel], P tiles [arbitrary/reduction])
#   The 0/1 scatter matrix tile is rebuilt in-register from the int32 index
#   vector (no HBM one-hot), and the matmul runs in bf16 with f32 accumulation.
# ----------------------------------------------------------------------------
def _scatter_accum_kernel(h3_ref, sc_ref, ht_ref, nc_ref, o_ref, acc_ref):
    ni = pl.program_id(0)
    pi = pl.program_id(1)

    @pl.when(pi == 0)
    def _():
        acc_ref[...] = jnp.zeros_like(acc_ref)

    tile_n = acc_ref.shape[0]
    tile_p = sc_ref.shape[1]
    # one-hot[r, c] = 1  iff  scatter_idx[c] == ni*tile_n + r   (padded cols: -1)
    row_ids = (jax.lax.broadcasted_iota(jnp.int32, (tile_n, tile_p), 0)
               + ni * tile_n)
    onehot = (row_ids == sc_ref[...]).astype(jnp.bfloat16)
    acc_ref[...] += jnp.dot(onehot, ht_ref[...],
                            preferred_element_type=jnp.float32)

    @pl.when(pi == pl.num_programs(1) - 1)
    def _():
        # eps factors are already folded into h_temp; nc is node centrality.
        o_ref[...] = h3_ref[...] + acc_ref[...] * nc_ref[...]


def pallas_scatter_accumulate(h3_pad, sc_all, h_temp_all, nc_pad,
                              tile_n, tile_ps):
    n_pad, f_out_pad = h3_pad.shape
    p_total = h_temp_all.shape[0]
    return pl.pallas_call(
        _scatter_accum_kernel,
        out_shape=jax.ShapeDtypeStruct((n_pad, f_out_pad), jnp.float32),
        grid=(n_pad // tile_n, p_total // tile_ps),
        in_specs=[
            pl.BlockSpec((tile_n, f_out_pad), lambda ni, pi: (ni, 0)),
            pl.BlockSpec((1, tile_ps), lambda ni, pi: (0, pi)),
            pl.BlockSpec((tile_ps, f_out_pad), lambda ni, pi: (pi, 0)),
            pl.BlockSpec((tile_n, 1), lambda ni, pi: (ni, 0)),
        ],
        out_specs=pl.BlockSpec((tile_n, f_out_pad), lambda ni, pi: (ni, 0)),
        scratch_shapes=[pltpu.VMEM((tile_n, f_out_pad), jnp.float32)],
        input_output_aliases={0: 0},
        compiler_params=pltpu.CompilerParams(
            dimension_semantics=("parallel", "arbitrary"),
            vmem_limit_bytes=VMEM_LIMIT),
    )(h3_pad, sc_all, h_temp_all, nc_pad)


# ----------------------------------------------------------------------------
# QGNNLayer forward (Pallas) and a pure-JAX reference
# ----------------------------------------------------------------------------
def qgnn_forward_pallas(h, pair_info, node_centrality, edge_centrality,
                        params, weights):
    pairs, degrees, scatter = pair_info
    n, f_in = h.shape
    w_lin, b_lin = weights["linear"]
    f_out = w_lin.shape[1]
    t = params["t"]
    combination = params["combination"]
    use_eps = params["scalar"]

    tile_n, n_pad = _pick_tile(n, SUBLANE, 1024, prefer_multi_step=True)
    f_in_pad = _round_up(f_in, LANE)
    f_out_pad = _round_up(f_out, LANE)

    h_f32 = h.astype(jnp.float32)
    h_pad = _pad_to(h_f32, (n_pad, f_in_pad))
    w_lin_pad = _pad_to(w_lin.astype(jnp.float32), (f_in_pad, f_out_pad))
    b_lin_pad = _pad_to(b_lin.reshape(1, f_out).astype(jnp.float32),
                        (1, f_out_pad))

    h3_pad = pallas_linear(h_pad, w_lin_pad, b_lin_pad, tile_n)

    active = [key for key in params["keys"] if int(scatter[key].shape[0]) > 0]
    if not active:
        return h3_pad[:n, :f_out]

    max_p = max(int(scatter[key].shape[0]) for key in active)
    tile_p, p_pad = _pick_tile(max_p, LANE, 1024)

    ec_f32 = edge_centrality.astype(jnp.float32)
    hcat_list, w_list, b_list, scale_list, sc_list = [], [], [], [], []
    for key in active:
        k = str(key)
        p = int(scatter[key].shape[0])
        w_k, b_k = weights["transform"][k]
        d = int(w_k.shape[0])

        # glue: gather h rows + hstack degree one-hots (stays in XLA).
        # TODO(synk): fuse this gather/concat into the transform kernel via
        # scalar-prefetched pair indices to avoid the HBM round trip.
        hcat_k = jnp.stack(
            [jnp.concatenate(
                [h_f32[pairs[key][i]], degrees[key][i].astype(jnp.float32)],
                axis=1)
             for i in range(t)], axis=0)                        # (t, p, d)
        hcat_list.append(_pad_to(hcat_k, (t, p_pad, d)).astype(jnp.bfloat16))

        w_list.append(_pad_to(w_k.astype(jnp.float32),
                              (d, f_out_pad)).astype(jnp.bfloat16))
        b_list.append(_pad_to(b_k.reshape(1, f_out).astype(jnp.float32),
                              (1, f_out_pad)))

        eps_scale = ((1.0 + weights["eps"][k][0]) if use_eps
                     else jnp.float32(1.0))
        if combination == "multi":
            base = (ec_f32 ** t).reshape(p, 1) * eps_scale
        else:
            base = jnp.ones((p, 1), jnp.float32) * eps_scale
        scale_list.append(_pad_to(base, (p_pad, 1)))            # pad rows -> 0

        sc_k = jnp.full((p_pad,), -1, jnp.int32).at[:p].set(
            scatter[key].astype(jnp.int32))
        sc_list.append(sc_k)

    hcat_all = jnp.stack(hcat_list)           # (K, t, p_pad, d)      bf16
    w_all = jnp.stack(w_list)                 # (K, d, f_out_pad)     bf16
    b_all = jnp.stack(b_list)                 # (K, 1, f_out_pad)     f32
    scale_all = jnp.stack(scale_list)         # (K, p_pad, 1)         f32
    n_keys = len(active)
    p_total = n_keys * p_pad
    sc_all = jnp.stack(sc_list).reshape(1, p_total)             # int32

    h_temp_all = pallas_transform(hcat_all, w_all, b_all, scale_all,
                                  tile_p, combination)
    h_temp_flat = h_temp_all.reshape(p_total, f_out_pad)        # bf16

    tile_ps = _largest_divisor_tile(p_total, LANE, 1024)
    nc_pad = _pad_to(node_centrality.astype(jnp.float32).reshape(n, 1),
                     (n_pad, 1))

    h3_pad = pallas_scatter_accumulate(h3_pad, sc_all, h_temp_flat, nc_pad,
                                       tile_n, tile_ps)
    return h3_pad[:n, :f_out]


def qgnn_forward_ref(h, pair_info, node_centrality, edge_centrality,
                     params, weights):
    pairs, degrees, scatter = pair_info
    n = h.shape[0]
    w_lin, b_lin = weights["linear"]
    h3 = h @ w_lin + b_lin
    f_out = w_lin.shape[1]
    for key in params["keys"]:
        if scatter[key].shape[0] == 0:
            continue
        k = str(key)
        w_k, b_k = weights["transform"][k]
        if params["combination"] == "multi":
            h_temp = 1.0
            for i in range(params["t"]):
                h_t = jnp.concatenate(
                    [h[pairs[key][i]], degrees[key][i]], axis=1)
                h_temp = h_temp * jax.nn.sigmoid(h_t @ w_k + b_k)
                h_temp = h_temp * edge_centrality.reshape(-1, 1)
        else:
            h_temp = 0.0
            for i in range(params["t"]):
                h_t = jnp.concatenate(
                    [h[pairs[key][i]], degrees[key][i]], axis=1)
                h_temp = h_temp + h_t
            h_temp = jax.nn.relu(h_temp @ w_k + b_k)
        h_sum = jnp.zeros((n, f_out), jnp.float32).at[scatter[key]].add(h_temp)
        if params["scalar"]:
            h_sum = (1.0 + weights["eps"][k][0]) * h_sum
        h_sum = h_sum * node_centrality.reshape(-1, 1)
        h3 = h3 + h_sum
    return h3


# ----------------------------------------------------------------------------
if __name__ == "__main__":
    rng = jax.random.PRNGKey(0)

    # small synthetic shapes consistent with the module
    N = 16               # number of nodes
    IN_FEATURES = 32
    OUT_FEATURES = 32
    T = 2                # params['t']
    ONE_HOT_LENGTH = 8   # TODO(synk): subgraph.one_hot_length(t) unavailable; fixed synthetic value
    P = 24               # pairs per key
    KEYS = [0, 1]

    # deterministic parameter init (shapes follow nn.Linear in __init__)
    def linear_init(key, fan_in, fan_out):
        kw, kb = jax.random.split(key)
        lim = 1.0 / jnp.sqrt(fan_in)
        w = jax.random.uniform(kw, (fan_in, fan_out), jnp.float32, -lim, lim)
        b = jax.random.uniform(kb, (fan_out,), jnp.float32, -lim, lim)
        return w, b

    keys_iter = jax.random.split(rng, 16)
    weights = {
        "linear": linear_init(keys_iter[0], IN_FEATURES, OUT_FEATURES),
        "transform": {},
        "eps": {},
    }
    for i, key in enumerate(KEYS):
        k = str(key)
        weights["transform"][k] = linear_init(
            keys_iter[1 + i], IN_FEATURES + ONE_HOT_LENGTH, OUT_FEATURES)
        weights["eps"][k] = jnp.zeros((1,), jnp.float32)  # torch.Tensor([0])

    # deterministic synthetic graph data
    h = jax.random.normal(keys_iter[8], (N, IN_FEATURES), jnp.float32)
    pairs, degrees, scatter = {}, {}, {}
    for i, key in enumerate(KEYS):
        kk = jax.random.fold_in(keys_iter[9], i)
        subkeys = jax.random.split(kk, 2 * T + 1)
        pairs[key] = [jax.random.randint(subkeys[j], (P,), 0, N)
                      for j in range(T)]
        degrees[key] = [
            jax.nn.one_hot(
                jax.random.randint(subkeys[T + j], (P,), 0, ONE_HOT_LENGTH),
                ONE_HOT_LENGTH, dtype=jnp.float32)
            for j in range(T)]
        scatter[key] = jax.random.randint(subkeys[2 * T], (P,), 0, N)
    node_centrality = jax.random.uniform(
        keys_iter[10], (N,), jnp.float32, 0.5, 1.5)
    edge_centrality = jax.random.uniform(
        keys_iter[11], (P,), jnp.float32, 0.5, 1.5)

    pair_info = (pairs, degrees, scatter)

    for combination in ("multi", "sum"):
        params = dict(keys=KEYS, d=2, t=T, scalar=True,
                      combination=combination)

        fwd = jax.jit(lambda h_, pi_, nc_, ec_, w_, p=params:
                      qgnn_forward_pallas(h_, pi_, nc_, ec_, p, w_))
        out = jax.block_until_ready(
            fwd(h, pair_info, node_centrality, edge_centrality, weights))

        ref = jax.block_until_ready(
            qgnn_forward_ref(h, pair_info, node_centrality, edge_centrality,
                             params, weights))

        assert out.shape == (N, OUT_FEATURES)
        # bf16 MXU path on the transform / scatter -> slightly looser tolerance
        assert jnp.allclose(out, ref, atol=5e-2, rtol=5e-2), (
            combination, float(jnp.max(jnp.abs(out - ref))))

    print("KERNEL_OK")
</pallas_src>

<mosaic_0001>
module attributes {stable_mosaic.version = 11 : i64} {
  func.func @_linear_kernel(%arg0: i32, %arg1: memref<8x128xf32, #tpu.memory_space<vmem>>, %arg2: memref<128x128xf32, #tpu.memory_space<vmem>>, %arg3: memref<1x128xf32, #tpu.memory_space<vmem>>, %arg4: memref<8x128xf32, #tpu.memory_space<vmem>>) attributes {dimension_semantics = [#tpu.dimension_semantics<parallel>], iteration_bounds = array<i64: 2>, scalar_prefetch = 0 : i64, scratch_operands = 0 : i64, tpu.core_type = #tpu.core_type<tc>, window_params = [{transform_indices = @transform_0, window_bounds = array<i64: 8, 128>}, {pipeline_mode = #tpu.pipeline_mode<synchronous>, transform_indices = @transform_1, window_bounds = array<i64: 128, 128>}, {pipeline_mode = #tpu.pipeline_mode<synchronous>, transform_indices = @transform_2, window_bounds = array<i64: 1, 128>}, {transform_indices = @transform_3, window_bounds = array<i64: 8, 128>}]} {
    %c0 = arith.constant 0 : index
    %c0_0 = arith.constant 0 : index
    %0 = vector.load %arg1[%c0, %c0_0] : memref<8x128xf32, #tpu.memory_space<vmem>>, vector<8x128xf32>
    %c0_1 = arith.constant 0 : index
    %c0_2 = arith.constant 0 : index
    %1 = vector.load %arg2[%c0_1, %c0_2] : memref<128x128xf32, #tpu.memory_space<vmem>>, vector<128x128xf32>
    %cst = arith.constant dense<0.000000e+00> : vector<8x128xf32>
    %2 = tpu.matmul %0, %1, %cst {dimension_numbers = #tpu.dot_dimension_numbers<[1], [0], [0], [1], [0, 0, 1, 1], [], []>} : vector<8x128xf32>, vector<128x128xf32>, vector<8x128xf32> -> vector<8x128xf32>
    %c0_3 = arith.constant 0 : index
    %c0_4 = arith.constant 0 : index
    %3 = vector.load %arg3[%c0_3, %c0_4] : memref<1x128xf32, #tpu.memory_space<vmem>>, vector<1x128xf32>
    %4 = vector.broadcast %3 : vector<1x128xf32> to vector<8x128xf32>
    %5 = arith.addf %2, %4 : vector<8x128xf32>
    %c0_5 = arith.constant 0 : index
    %c0_6 = arith.constant 0 : index
    %6 = vector.load %arg4[%c0_5, %c0_6] : memref<8x128xf32, #tpu.memory_space<vmem>>, vector<8x128xf32>
    tpu.vector_store %arg4[%c0_5, %c0_6], %5 {strides = array<i32>} : memref<8x128xf32, #tpu.memory_space<vmem>>, vector<8x128xf32>,
    return
  }
  func.func @transform_0(%arg0: i32) -> (i32, i32) {
    %c0_i32 = arith.constant 0 : i32
    %c0_i32_0 = arith.constant 0 : i32
    return %arg0, %c0_i32 : i32, i32
  }
  func.func @transform_1(%arg0: i32) -> (i32, i32) {
    %c0_i32 = arith.constant 0 : i32
    %c0_i32_0 = arith.constant 0 : i32
    %c0_i32_1 = arith.constant 0 : i32
    return %c0_i32, %c0_i32_0 : i32, i32
  }
  func.func @transform_2(%arg0: i32) -> (i32, i32) {
    %c0_i32 = arith.constant 0 : i32
    %c0_i32_0 = arith.constant 0 : i32
    %c0_i32_1 = arith.constant 0 : i32
    return %c0_i32, %c0_i32_0 : i32, i32
  }
  func.func @transform_3(%arg0: i32) -> (i32, i32) {
    %c0_i32 = arith.constant 0 : i32
    %c0_i32_0 = arith.constant 0 : i32
    return %arg0, %c0_i32 : i32, i32
  }
}

module attributes {stable_mosaic.version = 11 : i64} {
  func.func @_transform_kernel(%arg0: i32, %arg1: i32, %arg2: memref<1x2x128x40xbf16, #tpu.memory_space<vmem>>, %arg3: memref<1x40x128xbf16, #tpu.memory_space<vmem>>, %arg4: memref<1x1x128xf32, #tpu.memory_space<vmem>>, %arg5: memref<1x128x1xf32, #tpu.memory_space<vmem>>, %arg6: memref<1x128x128xbf16, #tpu.memory_space<vmem>>) attributes {dimension_semantics = [#tpu.dimension_semantics<parallel>, #tpu.dimension_semantics<parallel>], iteration_bounds = array<i64: 2, 1>, scalar_prefetch = 0 : i64, scratch_operands = 0 : i64, tpu.core_type = #tpu.core_type<tc>, window_params = [{transform_indices = @transform_0, window_bounds = array<i64: 1, 2, 128, 40>}, {transform_indices = @transform_1, window_bounds = array<i64: 1, 40, 128>}, {transform_indices = @transform_2, window_bounds = array<i64: 1, 1, 128>}, {transform_indices = @transform_3, window_bounds = array<i64: 1, 128, 1>}, {transform_indices = @transform_4, window_bounds = array<i64: 1, 128, 128>}]} {
    %c0 = arith.constant 0 : index
    %c0_0 = arith.constant 0 : index
    %c0_1 = arith.constant 0 : index
    %0 = vector.load %arg3[%c0, %c0_0, %c0_1] : memref<1x40x128xbf16, #tpu.memory_space<vmem>>, vector<1x40x128xbf16>
    %1 = vector.shape_cast %0 : vector<1x40x128xbf16> to vector<40x128xbf16>
    %c0_2 = arith.constant 0 : index
    %c0_3 = arith.constant 0 : index
    %c0_4 = arith.constant 0 : index
    %2 = vector.load %arg4[%c0_2, %c0_3, %c0_4] : memref<1x1x128xf32, #tpu.memory_space<vmem>>, vector<1x1x128xf32>
    %3 = vector.shape_cast %2 : vector<1x1x128xf32> to vector<1x128xf32>
    %c0_5 = arith.constant 0 : index
    %c0_6 = arith.constant 0 : index
    %c0_7 = arith.constant 0 : index
    %c0_8 = arith.constant 0 : index
    %4 = vector.load %arg2[%c0_5, %c0_6, %c0_7, %c0_8] : memref<1x2x128x40xbf16, #tpu.memory_space<vmem>>, vector<1x1x128x40xbf16>
    %5 = vector.shape_cast %4 : vector<1x1x128x40xbf16> to vector<128x40xbf16>
    %cst = arith.constant dense<0.000000e+00> : vector<128x128xf32>
    %6 = tpu.matmul %5, %1, %cst {dimension_numbers = #tpu.dot_dimension_numbers<[1], [0], [0], [1], [0, 0, 1, 1], [], []>} : vector<128x40xbf16>, vector<40x128xbf16>, vector<128x128xf32> -> vector<128x128xf32>
    %7 = vector.broadcast %3 : vector<1x128xf32> to vector<128x128xf32>
    %8 = arith.addf %6, %7 : vector<128x128xf32>
    %9 = arith.negf %8 : vector<128x128xf32>
    %10 = math.exp %9 : vector<128x128xf32>
    %cst_9 = arith.constant 1.000000e+00 : f32
    %11 = vector.broadcast %cst_9 : f32 to vector<128x128xf32>
    %12 = arith.addf %11, %10 : vector<128x128xf32>
    %13 = arith.divf %11, %12 : vector<128x128xf32>
    %c0_10 = arith.constant 0 : index
    %c1 = arith.constant 1 : index
    %c0_11 = arith.constant 0 : index
    %c0_12 = arith.constant 0 : index
    %14 = vector.load %arg2[%c0_10, %c1, %c0_11, %c0_12] : memref<1x2x128x40xbf16, #tpu.memory_space<vmem>>, vector<1x1x128x40xbf16>
    %15 = vector.shape_cast %14 : vector<1x1x128x40xbf16> to vector<128x40xbf16>
    %cst_13 = arith.constant dense<0.000000e+00> : vector<128x128xf32>
    %16 = tpu.matmul %15, %1, %cst_13 {dimension_numbers = #tpu.dot_dimension_numbers<[1], [0], [0], [1], [0, 0, 1, 1], [], []>} : vector<128x40xbf16>, vector<40x128xbf16>, vector<128x128xf32> -> vector<128x128xf32>
    %17 = vector.broadcast %3 : vector<1x128xf32> to vector<128x128xf32>
    %18 = arith.addf %16, %17 : vector<128x128xf32>
    %19 = arith.negf %18 : vector<128x128xf32>
    %20 = math.exp %19 : vector<128x128xf32>
    %cst_14 = arith.constant 1.000000e+00 : f32
    %21 = vector.broadcast %cst_14 : f32 to vector<128x128xf32>
    %22 = arith.addf %21, %20 : vector<128x128xf32>
    %23 = arith.divf %21, %22 : vector<128x128xf32>
    %24 = arith.mulf %13, %23 : vector<128x128xf32>
    %c0_15 = arith.constant 0 : index
    %c0_16 = arith.constant 0 : index
    %c0_17 = arith.constant 0 : index
    %25 = vector.load %arg5[%c0_15, %c0_16, %c0_17] : memref<1x128x1xf32, #tpu.memory_space<vmem>>, vector<1x128x1xf32>
    %26 = vector.shape_cast %25 : vector<1x128x1xf32> to vector<128x1xf32>
    %27 = vector.broadcast %26 : vector<128x1xf32> to vector<128x128xf32>
    %28 = arith.mulf %24, %27 : vector<128x128xf32>
    %29 = arith.truncf %28 : vector<128x128xf32> to vector<128x128xbf16>
    %c0_18 = arith.constant 0 : index
    %c0_19 = arith.constant 0 : index
    %c0_20 = arith.constant 0 : index
    %30 = vector.load %arg6[%c0_18, %c0_19, %c0_20] : memref<1x128x128xbf16, #tpu.memory_space<vmem>>, vector<1x128x128xbf16>
    %31 = vector.shape_cast %30 : vector<1x128x128xbf16> to vector<128x128xbf16>
    %32 = vector.shape_cast %29 : vector<128x128xbf16> to vector<1x128x128xbf16>
    tpu.vector_store %arg6[%c0_18, %c0_19, %c0_20], %32 {strides = array<i32>} : memref<1x128x128xbf16, #tpu.memory_space<vmem>>, vector<1x128x128xbf16>,
    return
  }
  func.func @transform_0(%arg0: i32, %arg1: i32) -> (i32, i32, i32, i32) {
    %c0_i32 = arith.constant 0 : i32
    %c0_i32_0 = arith.constant 0 : i32
    %c0_i32_1 = arith.constant 0 : i32
    return %arg0, %c0_i32, %arg1, %c0_i32_0 : i32, i32, i32, i32
  }
  func.func @transform_1(%arg0: i32, %arg1: i32) -> (i32, i32, i32) {
    %c0_i32 = arith.constant 0 : i32
    %c0_i32_0 = arith.constant 0 : i32
    %c0_i32_1 = arith.constant 0 : i32
    return %arg0, %c0_i32, %c0_i32_0 : i32, i32, i32
  }
  func.func @transform_2(%arg0: i32, %arg1: i32) -> (i32, i32, i32) {
    %c0_i32 = arith.constant 0 : i32
    %c0_i32_0 = arith.constant 0 : i32
    %c0_i32_1 = arith.constant 0 : i32
    return %arg0, %c0_i32, %c0_i32_0 : i32, i32, i32
  }
  func.func @transform_3(%arg0: i32, %arg1: i32) -> (i32, i32, i32) {
    %c0_i32 = arith.constant 0 : i32
    %c0_i32_0 = arith.constant 0 : i32
    return %arg0, %arg1, %c0_i32 : i32, i32, i32
  }
  func.func @transform_4(%arg0: i32, %arg1: i32) -> (i32, i32, i32) {
    %c0_i32 = arith.constant 0 : i32
    %c0_i32_0 = arith.constant 0 : i32
    return %arg0, %arg1, %c0_i32 : i32, i32, i32
  }
}

module attributes {stable_mosaic.version = 11 : i64} {
  func.func @_scatter_accum_kernel(%arg0: i32, %arg1: i32, %arg2: memref<8x128xf32, #tpu.memory_space<vmem>>, %arg3: memref<1x256xi32, #tpu.memory_space<vmem>>, %arg4: memref<256x128xbf16, #tpu.memory_space<vmem>>, %arg5: memref<8x1xf32, #tpu.memory_space<vmem>>, %arg6: memref<8x128xf32, #tpu.memory_space<vmem>>, %arg7: memref<8x128xf32, #tpu.memory_space<vmem>>) attributes {dimension_semantics = [#tpu.dimension_semantics<parallel>, #tpu.dimension_semantics<arbitrary>], iteration_bounds = array<i64: 2, 1>, scalar_prefetch = 0 : i64, scratch_operands = 1 : i64, tpu.core_type = #tpu.core_type<tc>, window_params = [{transform_indices = @transform_0, window_bounds = array<i64: 8, 128>}, {transform_indices = @transform_1, window_bounds = array<i64: 1, 256>}, {transform_indices = @transform_2, window_bounds = array<i64: 256, 128>}, {transform_indices = @transform_3, window_bounds = array<i64: 8, 1>}, {transform_indices = @transform_4, window_bounds = array<i64: 8, 128>}]} {
    %c0_i32 = arith.constant 0 : i32
    %0 = arith.cmpi eq, %arg1, %c0_i32 : i32
    %1 = arith.extui %0 : i1 to i32
    %c0_i32_0 = arith.constant 0 : i32
    %2 = arith.cmpi ne, %1, %c0_i32_0 : i32
    scf.if %2 {
      %cst_10 = arith.constant 0.000000e+00 : f32
      %21 = vector.broadcast %cst_10 : f32 to vector<8x128xf32>
      %c0_11 = arith.constant 0 : index
      %c0_12 = arith.constant 0 : index
      %22 = vector.load %arg7[%c0_11, %c0_12] : memref<8x128xf32, #tpu.memory_space<vmem>>, vector<8x128xf32>
      tpu.vector_store %arg7[%c0_11, %c0_12], %21 {strides = array<i32>} : memref<8x128xf32, #tpu.memory_space<vmem>>, vector<8x128xf32>,
    } else {
    }
    %3 = tpu.iota {dimensions = array<i32: 0>} : vector<8x256xi32>
    %c8_i32 = arith.constant 8 : i32
    %4 = arith.muli %arg0, %c8_i32 : i32
    %5 = vector.broadcast %4 : i32 to vector<8x256xi32>
    %6 = arith.addi %3, %5 : vector<8x256xi32>
    %c0 = arith.constant 0 : index
    %c0_1 = arith.constant 0 : index
    %7 = vector.load %arg3[%c0, %c0_1] : memref<1x256xi32, #tpu.memory_space<vmem>>, vector<1x256xi32>
    %8 = vector.broadcast %7 : vector<1x256xi32> to vector<8x256xi32>
    %9 = arith.cmpi eq, %6, %8 : vector<8x256xi32>
    %10 = arith.extui %9 : vector<8x256xi1> to vector<8x256xi32>
    %11 = arith.sitofp %10 : vector<8x256xi32> to vector<8x256xf32>
    %12 = arith.truncf %11 : vector<8x256xf32> to vector<8x256xbf16>
    %c0_2 = arith.constant 0 : index
    %c0_3 = arith.constant 0 : index
    %13 = vector.load %arg7[%c0_2, %c0_3] : memref<8x128xf32, #tpu.memory_space<vmem>>, vector<8x128xf32>
    %c0_4 = arith.constant 0 : index
    %c0_5 = arith.constant 0 : index
    %14 = vector.load %arg4[%c0_4, %c0_5] : memref<256x128xbf16, #tpu.memory_space<vmem>>, vector<256x128xbf16>
    %cst = arith.constant dense<0.000000e+00> : vector<8x128xf32>
    %15 = tpu.matmul %12, %14, %cst {dimension_numbers = #tpu.dot_dimension_numbers<[1], [0], [0], [1], [0, 0, 1, 1], [], []>} : vector<8x256xbf16>, vector<256x128xbf16>, vector<8x128xf32> -> vector<8x128xf32>
    %16 = arith.addf %13, %15 : vector<8x128xf32>
    %c0_6 = arith.constant 0 : index
    %c0_7 = arith.constant 0 : index
    %17 = vector.load %arg7[%c0_6, %c0_7] : memref<8x128xf32, #tpu.memory_space<vmem>>, vector<8x128xf32>
    tpu.vector_store %arg7[%c0_6, %c0_7], %16 {strides = array<i32>} : memref<8x128xf32, #tpu.memory_space<vmem>>, vector<8x128xf32>,
    %c0_i32_8 = arith.constant 0 : i32
    %18 = arith.cmpi eq, %arg1, %c0_i32_8 : i32
    %19 = arith.extui %18 : i1 to i32
    %c0_i32_9 = arith.constant 0 : i32
    %20 = arith.cmpi ne, %19, %c0_i32_9 : i32
    scf.if %20 {
      %c0_10 = arith.constant 0 : index
      %c0_11 = arith.constant 0 : index
      %21 = vector.load %arg2[%c0_10, %c0_11] : memref<8x128xf32, #tpu.memory_space<vmem>>, vector<8x128xf32>
      %c0_12 = arith.constant 0 : index
      %c0_13 = arith.constant 0 : index
      %22 = vector.load %arg7[%c0_12, %c0_13] : memref<8x128xf32, #tpu.memory_space<vmem>>, vector<8x128xf32>
      %c0_14 = arith.constant 0 : index
      %c0_15 = arith.constant 0 : index
      %23 = vector.load %arg5[%c0_14, %c0_15] : memref<8x1xf32, #tpu.memory_space<vmem>>, vector<8x1xf32>
      %24 = vector.broadcast %23 : vector<8x1xf32> to vector<8x128xf32>
      %25 = arith.mulf %22, %24 : vector<8x128xf32>
      %26 = arith.addf %21, %25 : vector<8x128xf32>
      %c0_16 = arith.constant 0 : index
      %c0_17 = arith.constant 0 : index
      %27 = vector.load %arg6[%c0_16, %c0_17] : memref<8x128xf32, #tpu.memory_space<vmem>>, vector<8x128xf32>
      tpu.vector_store %arg6[%c0_16, %c0_17], %26 {strides = array<i32>} : memref<8x128xf32, #tpu.memory_space<vmem>>, vector<8x128xf32>,
    } else {
    }
    return
  }
  func.func @transform_0(%arg0: i32, %arg1: i32) -> (i32, i32) {
    %c0_i32 = arith.constant 0 : i32
    %c0_i32_0 = arith.constant 0 : i32
    return %arg0, %c0_i32 : i32, i32
  }
  func.func @transform_1(%arg0: i32, %arg1: i32) -> (i32, i32) {
    %c0_i32 = arith.constant 0 : i32
    %c0_i32_0 = arith.constant 0 : i32
    return %c0_i32, %arg1 : i32, i32
  }
  func.func @transform_2(%arg0: i32, %arg1: i32) -> (i32, i32) {
    %c0_i32 = arith.constant 0 : i32
    %c0_i32_0 = arith.constant 0 : i32
    return %arg1, %c0_i32 : i32, i32
  }
  func.func @transform_3(%arg0: i32, %arg1: i32) -> (i32, i32) {
    %c0_i32 = arith.constant 0 : i32
    %c0_i32_0 = arith.constant 0 : i32
    return %arg0, %c0_i32 : i32, i32
  }
  func.func @transform_4(%arg0: i32, %arg1: i32) -> (i32, i32) {
    %c0_i32 = arith.constant 0 : i32
    %c0_i32_0 = arith.constant 0 : i32
    return %arg0, %c0_i32 : i32, i32
  }
}

</mosaic_0001>

<bundles_post_ra>
// kernel: _lambda_.3
= control target key start
LH: loop header
LB: loop body
LE: loop exit
PB: predicated region body
PF: predicated region fallthrough
CT: control target
= control target key end

     0   :  { %s442_s12 = smov 0   ;;  %s514_s0 = inlined_call_operand.vmem [shape: f32[16,128], index: 0, kind: input, shape index: {}]   ;;  %s515_s1 = inlined_call_operand.vmem [shape: f32[128,128], index: 1, kind: input, shape index: {}]   ;;  %s516_s2 = inlined_call_operand.vmem [shape: f32[1,128], index: 2, kind: input, shape index: {}]   ;;  %s517_s3 = inlined_call_operand.vmem [shape: f32[16,128], index: 3, kind: output, shape index: {}]  }
   0x1 LB: > { %s314_s13 = sadd.s32 4294967295, %s417_s12   ;;  %p318_p0 = scmp.ge.s32.totalorder %s417_s12, 1  ;;  %s417_s12 = sphi %s442_s12, %s13_s12  }
   0x2   : > { %p136_p1 = scmp.lt.s32.totalorder %s417_s12, 3 }
   0x4   : > { %p137_p2 = pnand %p318_p0, %p136_p1 }
   0x5   : > { %v167_v0 = vld [vmem:[%s515_s1] sm:$0xff] (!%p137_p2)  ;;  %v168_v1 = vld [vmem:[%s515_s1 + $0x8] sm:$0xff] (!%p137_p2)  ;;  %v169_v2 = vld [vmem:[%s515_s1 + $0x10] sm:$0xff] (!%p137_p2)  ;;  %v419_v3 = vmov (!%p137_p2), 0.0|0.0   ;;  %vm420_vm0 = vmmov (!%p137_p2), 0   ;;  %v421_v6 = vmov (!%p137_p2), 0.0  }
   0x6   : > { %140 = sbr.rel (%p137_p2) target bundleno = 254 (0xfe), region = 32  ;;  %376 = vmatprep.subr.bf16.mxu0 (!%p137_p2), %v419_v3  ;;  %v377_v4 = vpack.c.bf16 (!%p137_p2), %v168_v1, %v167_v0  ;;  %v170_v5 = vld [vmem:[%s515_s1 + $0x18] sm:$0xff] (!%p137_p2)  ;;  %373 = vmatprep.mubr.msk.f32.mxu0 (!%p137_p2), %vm420_vm0, %v421_v6  ;;  %v171_v8 = vld [vmem:[%s515_s1 + $0x20] sm:$0xff] (!%p137_p2)  ;;  %v172_v9 = vld [vmem:[%s515_s1 + $0x28] sm:$0xff] (!%p137_p2)  ;;  %p158_p3 = scmp.lt.s32.totalorder (!%p137_p2), %s314_s13, 1 }
   0x7   : > { %v380_v7 = vpack.c.bf16 (!%p137_p2), %v170_v5, %v169_v2  ;;  %v383_v10 = vpack.c.bf16 (!%p137_p2), %v172_v9, %v171_v8  ;;  %v173_v11 = vld [vmem:[%s515_s1 + $0x30] sm:$0xff] (!%p137_p2)  ;;  %v174_v12 = vld [vmem:[%s515_s1 + $0x38] sm:$0xff] (!%p137_p2)  ;;  %v175_v14 = vld [vmem:[%s515_s1 + $0x40] sm:$0xff] (!%p137_p2) }
   0x8   : > { %378 = vmatpush3.bf16.msra.mxu0 (!%p137_p2), %v377_v4  ;;  %v386_v13 = vpack.c.bf16 (!%p137_p2), %v174_v12, %v173_v11  ;;  %v176_v15 = vld [vmem:[%s515_s1 + $0x48] sm:$0xff] (!%p137_p2)  ;;  %v177_v17 = vld [vmem:[%s515_s1 + $0x50] sm:$0xff] (!%p137_p2)  ;;  %v178_v18 = vld [vmem:[%s515_s1 + $0x58] sm:$0xff] (!%p137_p2) }
   0x9   : > { %379 = vmatprep.subr.bf16.mxu0 (!%p137_p2), %v419_v3  ;;  %v389_v16 = vpack.c.bf16 (!%p137_p2), %v176_v15, %v175_v14  ;;  %v392_v19 = vpack.c.bf16 (!%p137_p2), %v178_v18, %v177_v17  ;;  %v179_v20 = vld [vmem:[%s515_s1 + $0x60] sm:$0xff] (!%p137_p2)  ;;  %v180_v21 = vld [vmem:[%s515_s1 + $0x68] sm:$0xff] (!%p137_p2)  ;;  %v181_v23 = vld [vmem:[%s515_s1 + $0x70] sm:$0xff] (!%p137_p2) }
   0xa   : > { %v395_v22 = vpack.c.bf16 (!%p137_p2), %v180_v21, %v179_v20  ;;  %v182_v24 = vld [vmem:[%s515_s1 + $0x78] sm:$0xff] (!%p137_p2)  ;;  %v321_v27 = vld [vmem:[%s516_s2] ss:$0 sm:$0xff] (!%p137_p2) }
   0xb   : > { %v398_v25 = vpack.c.bf16 (!%p137_p2), %v182_v24, %v181_v23 }
   0xc   : > { %381 = vmatpush3.bf16.msra.mxu0 (!%p137_p2), %v380_v7 }
   0xd   : > { %382 = vmatprep.subr.bf16.mxu0 %v419_v3  ;;  %s519_s13 = smov (!%p158_p3, %s314_s13), 1 }
   0xe   : > { %s319_s21 = sshll.u32 %s519_s13, 3 }
   0xf   : > { %s161_s24 = scalar_lea.vmem %s514_s0, %s319_s21  ;;  %s165_s29 = scalar_lea.vmem %s517_s3, %s319_s21 }
  0x10   : > { %384 = vmatpush3.bf16.msra.mxu0 %v383_v10  ;;  %v166_v26 = vld [vmem:[%s161_s24] sm:$0xff] }
  0x11   : > { %385 = vmatprep.subr.bf16.mxu0 %v419_v3 }
  0x14   : > { %387 = vmatpush3.bf16.msra.mxu0 %v386_v13 }
  0x15   : > { %388 = vmatprep.subr.bf16.mxu0 %v419_v3 }
  0x18   : > { %390 = vmatpush3.bf16.msra.mxu0 %v389_v16 }
  0x19   : > { %391 = vmatprep.subr.bf16.mxu0 %v419_v3 }
  0x1c   : > { %393 = vmatpush3.bf16.msra.mxu0 %v392_v19 }
  0x1d   : > { %394 = vmatprep.subr.bf16.mxu0 %v419_v3 }
  0x20   : > { %396 = vmatpush3.bf16.msra.mxu0 %v395_v22 }
  0x21   : > { %397 = vmatprep.subr.bf16.mxu0 %v419_v3 }
  0x24   : > { %399 = vmatpush3.bf16.msra.mxu0 %v398_v25 }
  0x27   : > { %374 = vmatmul.mubr.f32.vlgmr.msra.gmra.mrb[0].mxu0 %v166_v26 }
  0xfa   : > { %v256_v28 = vpop.f32.mrb[0].mxu0 }
  0xfb   : > { %v257_v29 = vadd.f32 %v321_v27, %v256_v28  ;;  %v375_v30 = vpop.f32.mrb[1].mxu0 }
  0xfd   : > { %260 = vst [vmem:[%s165_s29] sm:$0xff] %v257_v29 }
  0xfe PF: > { %s13_s12 = sadd.s32 1, %s417_s12  }
  0xff   : > { %p10_p4 = scmp.ge.s32.totalorder %s13_s12, 4  }
 0x101   :  { %12 = sbr.rel (!%p10_p4) target bundleno = 1 (0x1), region = 62 }

// kernel: _lambda_.5
= control target key start
LH: loop header
LB: loop body
LE: loop exit
PB: predicated region body
PF: predicated region fallthrough
CT: control target
= control target key end

     0   :  { %s728_s15 = smov 0   ;;  %s730_s16 = smov 0   ;;  %s825_s0 = inlined_call_operand.vmem [shape: f32[16,128], index: 0, kind: input, shape index: {}, may-alias: {0,4}]   ;;  %s826_s1 = inlined_call_operand.vmem [shape: s32[1,256], index: 1, kind: input, shape index: {}]   ;;  %s827_s2 = inlined_call_operand.vmem [shape: bf16[256,128], index: 2, kind: input, shape index: {}]   ;;  %s828_s3 = inlined_call_operand.vmem [shape: f32[16,1], index: 3, kind: input, shape index: {}]   ;;  %s829_s4 = inlined_call_operand.vmem [shape: f32[16,128], index: 4, kind: output, shape index: {}, may-alias: {0,4}]  }
   0x1   :  { %s732_s17 = smov 0  }
   0x2 LB: > { %s26_s18 = sadd.s32 1, %s695_s16  ;;  %p583_p0 = scmp.ge.s32.totalorder %s699_s17, 1  ;;  %s699_s17 = sphi %s732_s17, %s14_s17   ;;  %s695_s16 = sphi %s730_s16, %s831_s16   ;;  %s691_s15 = sphi %s728_s15, %s830_s15  }
   0x3   : > { %p28_p1 = scmp.ge.s32.totalorder %s26_s18, 2  ;;  %p203_p2 = scmp.lt.s32.totalorder %s699_s17, 3 }
   0x5   : > { %s833_s18 = smov (%p28_p1, %s26_s18), 0  ;;  %p204_p3 = pnand %p583_p0, %p203_p2 }
   0x6   : > { %v661_v0 = vld [vmem:[%s827_s2 + $0x40] sm:$0xff] (!%p204_p3)   ;;  %v663_v2 = vld [vmem:[%s827_s2 + $0x48] sm:$0xff] (!%p204_p3)   ;;  %v701_v3 = vmov (!%p204_p3), 0   ;;  %p240_p4 = scmp.lt.s32.totalorder (!%p204_p3), %s691_s15, 1  ;;  %v665_v5 = vld [vmem:[%s827_s2 + $0x50] sm:$0xff] (!%p204_p3)   ;;  %v269_v6 = vlaneseq (!%p204_p3)  ;;  %s587_s8 = sshll.u32 (!%p204_p3), %s691_s15, 3 }
   0x7   : > { %207 = sbr.rel (%p204_p3) target bundleno = 259 (0x103), region = 36  ;;  %v662_v1 = vld [vmem:[%s827_s2] sm:$0xff] (!%p204_p3)   ;;  %612 = vmatprep.subr.bf16.mxu0 (!%p204_p3), %v661_v0  ;;  %660 = vset.pattern.permute.xlu0 (!%p204_p3), %v701_v3  ;;  %v664_v4 = vld [vmem:[%s827_s2 + $0x8] sm:$0xff] (!%p204_p3)   ;;  %v666_v7 = vld [vmem:[%s827_s2 + $0x10] sm:$0xff] (!%p204_p3)   ;;  %v272_v12 = vstv (!%p204_p3), %s587_s8  ;;  %v702_v23 = vmov (!%p204_p3), 1.0|1.0  }
   0x8   : > { %613 = vmatpush3.bf16.msra.mxu0 (!%p204_p3), %v662_v1  ;;  %v667_v8 = vld [vmem:[%s827_s2 + $0x58] sm:$0xff] (!%p204_p3)   ;;  %v270_v9 = vshrl.u32 (!%p204_p3), %v269_v6, 7  ;;  %v669_v11 = vld [vmem:[%s827_s2 + $0x60] sm:$0xff] (!%p204_p3)   ;;  %v671_v16 = vld [vmem:[%s827_s2 + $0x68] sm:$0xff] (!%p204_p3)  }
   0x9   : > { %614 = vmatprep.subr.bf16.mxu0 (!%p204_p3), %v663_v2  ;;  %v668_v10 = vld [vmem:[%s827_s2 + $0x18] sm:$0xff] (!%p204_p3)   ;;  %v670_v14 = vld [vmem:[%s827_s2 + $0x20] sm:$0xff] (!%p204_p3)   ;;  %v672_v20 = vld [vmem:[%s827_s2 + $0x28] sm:$0xff] (!%p204_p3)  }
   0xa   : > { %v281_v13 = vsub.s32 (!%p204_p3), 1, %v270_v9  ;;  %v273_v15 = vadd.s32 (!%p204_p3), %v272_v12, %v270_v9  ;;  %v274_v17 = vld [vmem:[%s826_s1] sm:$0x3] (!%p204_p3)  ;;  %v673_v21 = vld [vmem:[%s827_s2 + $0x70] sm:$0xff] (!%p204_p3)   ;;  %v277_v22 = vsub.s32 (!%p204_p3), 0, %v270_v9  ;;  %v675_v25 = vld [vmem:[%s827_s2 + $0x78] sm:$0xff] (!%p204_p3)  }
   0xb   : > { %v674_v24 = vld [vmem:[%s827_s2 + $0x30] sm:$0xff] (!%p204_p3)   ;;  %v676_v27 = vld [vmem:[%s827_s2 + $0x38] sm:$0xff] (!%p204_p3)  }
   0xc   : > { %615 = vmatpush3.bf16.msra.mxu0 (!%p204_p3), %v664_v4  ;;  %v282_v19 = vrot.slane (!%p204_p3), %v274_v17, %v281_v13  ;;  %v278_v26 = vrot.slane (!%p204_p3), %v274_v17, %v277_v22 }
   0xd   : > { %616 = vmatprep.subr.bf16.mxu0 (!%p204_p3), %v665_v5 }
   0xe   : > { %s241_s29 = scalar_select %p240_p4, %s691_s15, 1  ;;  %vm284_vm0 = vcmp.eq.s32.totalorder %v273_v15, %v282_v19  ;;  %vm283_vm2 = vcmp.eq.s32.totalorder %v273_v15, %v278_v26 }
   0xf   : > { %vm606_vm1 = vmpackc.low %vm284_vm0, %vm284_vm0 }
  0x10   : > { %s772_s9 = sshll.u32 %s241_s29, 3  ;;  %617 = vmatpush3.bf16.msra.mxu0 %v666_v7  ;;  %607 = vmatprep.mubr.msk.bf16.mxu0 %vm606_vm1, %v702_v23  ;;  %vm608_vm3 = vmpackc.low %vm283_vm2, %vm283_vm2 }
  0x11   : > { %618 = vmatprep.subr.bf16.mxu0 %v667_v8  ;;  %s258_s20 = scalar_lea.vmem %s828_s3, %s772_s9  ;;  %s243_s13 = scalar_lea.vmem %s825_s0, %s772_s9 }
  0x12   : > { %v467_v18 = vld [vmem:[%s258_s20] sm:$0xff]  ;;  %s262_s20 = scalar_lea.vmem %s829_s4, %s772_s9 }
  0x13   : > { %470 = vperm.xlu0 %660, %v467_v18   ;;  %v465_v34 = vld [vmem:[%s243_s13] sm:$0xff] }
  0x14   : > { %619 = vmatpush3.bf16.msra.mxu0 %v668_v10 }
  0x15   : > { %620 = vmatprep.subr.bf16.mxu0 %v669_v11 }
  0x18   : > { %621 = vmatpush3.bf16.msra.mxu0 %v670_v14 }
  0x19   : > { %622 = vmatprep.subr.bf16.mxu0 %v671_v16 }
  0x1c   : > { %623 = vmatpush3.bf16.msra.mxu0 %v672_v20 }
  0x1d   : > { %624 = vmatprep.subr.bf16.mxu0 %v673_v21 }
  0x20   : > { %625 = vmatpush3.bf16.msra.mxu0 %v674_v24 }
  0x21   : > { %626 = vmatprep.subr.bf16.mxu0 %v675_v25 }
  0x24   : > { %627 = vmatpush3.bf16.msra.mxu0 %v676_v27 }
  0x27   : > { %609 = vmatmul.mubr.msk.bf16.vlgmr.msra.gmra.mrb[0].mxu0 %vm608_vm3, %v702_v23 }
  0x92   : > { %v471_v30 = vpop.permute.xlu0 %470 }
  0xfa   : > { %v628_v28 = vpop.f32.mrb[0].mxu0 }
  0xfb   : > { %v629_v29 = vpop.f32.mrb[1].mxu0 }
  0xfc   : > { %v630_v31 = vadd.f32 %v629_v29, %v628_v28  ;;  %v631_v32 = vpop.f32.mrb[2].mxu0 }
  0xfd   : > { %v632_v33 = vpop.f32.mrb[3].mxu0 }
  0xfe   : > { %v473_v35 = vmul.f32 %v630_v31, %v471_v30 }
 0x100   : > { %v474_v36 = vadd.f32 %v473_v35, %v465_v34 }
 0x102   : > { %475 = vst [vmem:[%s262_s20] sm:$0xff] %v474_v36 }
 0x103 PF: > { %s14_s17 = sadd.s32 1, %s699_s17   ;;  %s830_s15 = smov %s695_s16 }
 0x104   : > { %p11_p5 = scmp.ge.s32.totalorder %s14_s17, 4   ;;  %s831_s16 = smov %s833_s18 }
 0x106   :  { %13 = sbr.rel (!%p11_p5) target bundleno = 2 (0x2), region = 83 }

// kernel: _lambda_.4
= control target key start
LH: loop header
LB: loop body
LE: loop exit
PB: predicated region body
PF: predicated region fallthrough
CT: control target
= control target key end

     0   :  { %s1694_s15 = smov 0   ;;  %s1696_s16 = smov 0   ;;  %s1872_s0 = inlined_call_operand.vmem [shape: bf16[2,2,128,40], index: 0, kind: input, shape index: {}]   ;;  %s1873_s1 = inlined_call_operand.vmem [shape: bf16[2,40,128], index: 1, kind: input, shape index: {}]   ;;  %s1874_s2 = inlined_call_operand.vmem [shape: f32[2,1,128], index: 2, kind: input, shape index: {}]   ;;  %s1875_s3 = inlined_call_operand.vmem [shape: f32[2,128,1], index: 3, kind: input, shape index: {}]   ;;  %s1876_s4 = inlined_call_operand.vmem [shape: bf16[2,128,128], index: 4, kind: output, shape index: {}]  }
   0x1   :  { %s1698_s17 = smov 0  }
   0x2 LB: > { %s26_s18 = sadd.s32 1, %s1662_s16  ;;  %p1225_p0 = scmp.ge.s32.totalorder %s1666_s17, 1  ;;  %s1666_s17 = sphi %s1698_s17, %s14_s17   ;;  %s1662_s16 = sphi %s1696_s16, %s1878_s16   ;;  %s1658_s15 = sphi %s1694_s15, %s1877_s15  }
   0x3   : > { %p28_p1 = scmp.ge.s32.totalorder %s26_s18, 2  ;;  %p218_p2 = scmp.lt.s32.totalorder %s1666_s17, 3 }
   0x5   : > { %s1880_s18 = smov (%p28_p1, %s26_s18), 0  ;;  %p219_p3 = pnand %p1225_p0, %p218_p2 }
   0x6   : > { %p270_p4 = scmp.lt.s32.totalorder (!%p219_p3), %s1658_s15, 1  ;;  %v1668_v0 = vmov (!%p219_p3), 0   ;;  %vm391_vm0 = vcmask (!%p219_p3), 326656   ;;  %vm416_vm1 = vcmask (!%p219_p3), 1043456  }
   0x7   : > { %222 = sbr.rel (%p219_p3) target bundleno = 337 (0x151), region = 36  ;;  %1496 = vset.pattern.permute.xlu1 (!%p219_p3), %v1668_v0  ;;  %1495 = vset.pattern.permute.xlu0 (!%p219_p3), %v1668_v0 }
   0xe   : > { %s1882_s15 = smov (!%p270_p4, %s1658_s15), 1 }
   0xf   : > { %s1335_s19 = sshll.u32 %s1882_s15, 7  ;;  %s1469_s20 = smul.u32 20, %s1882_s15 }
  0x10   : > { %s1721_s23 = scalar_lea.vmem %s1872_s0, %s1335_s19  ;;  %s1741_s29 = scalar_lea.vmem %s1875_s3, %s1335_s19 }
  0x11   : > { %s283_s26 = scalar_lea.vmem %s1873_s1, %s1469_s20  ;;  %v1500_v3 = vld [vmem:[%s1721_s23] sm:$0xff]   ;;  %v1502_v7 = vld [vmem:[%s1721_s23 + $0x8] sm:$0xff]   ;;  %v1504_v9 = vld [vmem:[%s1721_s23 + $0x10] sm:$0xff]   ;;  %s286_s6 = scalar_lea.vmem %s1874_s2, %s1882_s15 }
  0x12   : > { %v1497_v1 = vld [vmem:[%s283_s26] sm:$0xff]   ;;  %v1498_v2 = vld [vmem:[%s283_s26 + $0x8] sm:$0xff]   ;;  %v1499_v5 = vld [vmem:[%s283_s26 + $0x10] ss:$0 sps:$4 sm:$0xff]   ;;  %1429 = vmatprep.mubr.msk.bf16.mxu0 %vm391_vm0, %v1500_v3  ;;  %s1337_s7 = sshll.u32 %s1882_s15, 6 }
  0x13   : > { %1423 = vmatprep.subr.bf16.mxu0 %v1497_v1  ;;  %1445 = vmatprep.subr.bf16.mxu1 %v1497_v1  ;;  %v1501_v4 = vld [vmem:[%s1721_s23 + $0x40] sm:$0xff]   ;;  %v418_v6 = vsel %vm416_vm1, %v1499_v5, 0  ;;  %v1503_v8 = vld [vmem:[%s1721_s23 + $0x48] sm:$0xff]   ;;  %v1505_v10 = vld [vmem:[%s1721_s23 + $0x50] sm:$0xff]   ;;  %s1835_s10 = scalar_lea.vmem %s1876_s4, %s1337_s7 }
  0x14   : > { %1424 = vmatpush3.bf16.msra.mxu0 %v1497_v1  ;;  %1446 = vmatpush3.bf16.msra.mxu1 %v1497_v1  ;;  %v1506_v11 = vld [vmem:[%s1721_s23 + $0x18] sm:$0xff]   ;;  %v905_v13 = vld [vmem:[%s1741_s29 + $0x10] sm:$0xff]  ;;  %v903_v14 = vld [vmem:[%s1741_s29] sm:$0xff] }
  0x15   : > { %1425 = vmatprep.subr.bf16.mxu0 %v1498_v2  ;;  %1447 = vmatprep.subr.bf16.mxu1 %v1498_v2  ;;  %v1507_v12 = vld [vmem:[%s1721_s23 + $0x58] sm:$0xff]   ;;  %v1508_v15 = vld [vmem:[%s1721_s23 + $0x20] sm:$0xff]   ;;  %v904_v18 = vld [vmem:[%s1741_s29 + $0x8] sm:$0xff] }
  0x16   : > { %1451 = vmatprep.mubr.msk.bf16.mxu1 %vm391_vm0, %v1501_v4  ;;  %v1509_v16 = vld [vmem:[%s1721_s23 + $0x60] sm:$0xff]   ;;  %931 = vperm.xlu1 %1496, %v905_v13   ;;  %v906_v17 = vld [vmem:[%s1741_s29 + $0x18] sm:$0xff]  ;;  %v908_v19 = vld [vmem:[%s1741_s29 + $0x28] sm:$0xff] }
  0x17   : > { %921 = vperm.xlu0 %1495, %v903_v14   ;;  %v907_v20 = vld [vmem:[%s1741_s29 + $0x20] sm:$0xff]  ;;  %v1510_v21 = vld [vmem:[%s1721_s23 + $0x28] sm:$0xff]   ;;  %v1512_v23 = vld [vmem:[%s1721_s23 + $0x30] sm:$0xff]  }
  0x18   : > { %1426 = vmatpush3.bf16.msra.mxu0 %v1498_v2  ;;  %1448 = vmatpush3.bf16.msra.mxu1 %v1498_v2  ;;  %v1511_v22 = vld [vmem:[%s1721_s23 + $0x68] sm:$0xff]   ;;  %v1513_v24 = vld [vmem:[%s1721_s23 + $0x70] sm:$0xff]   ;;  %v910_v25 = vld [vmem:[%s1741_s29 + $0x38] sm:$0xff] }
  0x19   : > { %1467 = vmatprep.subr.msk.bf16.mxu0 %vm416_vm1, %v1499_v5  ;;  %1468 = vmatprep.subr.msk.bf16.mxu1 %vm416_vm1, %v1499_v5  ;;  %v909_v26 = vld [vmem:[%s1741_s29 + $0x30] sm:$0xff]  ;;  %v912_v27 = vld [vmem:[%s1741_s29 + $0x48] sm:$0xff]  ;;  %v911_v28 = vld [vmem:[%s1741_s29 + $0x40] sm:$0xff] }
  0x1a   : > { %936 = vperm.xlu1 %1496, %v906_v17   ;;  %v1514_v29 = vld [vmem:[%s1721_s23 + $0x38] sm:$0xff]   ;;  %v913_v32 = vld [vmem:[%s1741_s29 + $0x50] sm:$0xff]  ;;  %v916_v33 = vld [vmem:[%s1741_s29 + $0x68] sm:$0xff] }
  0x1b   : > { %926 = vperm.xlu0 %1495, %v904_v18   ;;  %v1515_v30 = vld [vmem:[%s1721_s23 + $0x78] sm:$0xff]   ;;  %v915_v34 = vld [vmem:[%s1741_s29 + $0x60] sm:$0xff]  ;;  %v917_v36 = vld [vmem:[%s1741_s29 + $0x70] sm:$0xff] }
  0x1c   : > { %1428 = vmatpush3.bf16.msra.mxu0 %v418_v6  ;;  %1450 = vmatpush3.bf16.msra.mxu1 %v418_v6  ;;  %v914_v31 = vld [vmem:[%s1741_s29 + $0x58] sm:$0xff]  ;;  %v1785_v37 = vld [vmem:[%s286_s6] ss:$0 sm:$0xff] }
  0x1d   : > { %v918_v35 = vld [vmem:[%s1741_s29 + $0x78] sm:$0xff] }
  0x1e   : > { %946 = vperm.xlu1 %1496, %v908_v19  }
  0x1f   : > { %1430 = vmatmul.mubr.msk.bf16.vlgmr.msra.gmra.mrb[0].mxu0 %vm391_vm0, %v1502_v7  ;;  %1452 = vmatmul.mubr.msk.bf16.vlgmr.msra.gmra.mrb[0].mxu1 %vm391_vm0, %v1503_v8 }
  0x20   : > { %1433 = vmatprep.mubr.msk.bf16.mxu0 %vm391_vm0, %v1504_v9  ;;  %1455 = vmatprep.mubr.msk.bf16.mxu1 %vm391_vm0, %v1505_v10 }
  0x21   : > { %941 = vperm.xlu0 %1495, %v907_v20  }
  0x22   : > { %956 = vperm.xlu1 %1496, %v910_v25  }
  0x25   : > { %951 = vperm.xlu0 %1495, %v909_v26  }
  0x26   : > { %966 = vperm.xlu1 %1496, %v912_v27  }
  0x27   : > { %1434 = vmatmul.mubr.msk.bf16.gmra.mrb[4].mxu0 %vm391_vm0, %v1506_v11  ;;  %1456 = vmatmul.mubr.msk.bf16.gmra.mrb[4].mxu1 %vm391_vm0, %v1507_v12 }
  0x28   : > { %1437 = vmatprep.mubr.msk.bf16.mxu0 %vm391_vm0, %v1508_v15  ;;  %1459 = vmatprep.mubr.msk.bf16.mxu1 %vm391_vm0, %v1509_v16 }
  0x29   : > { %961 = vperm.xlu0 %1495, %v911_v28  }
  0x2a   : > { %976 = vperm.xlu1 %1496, %v914_v31  }
  0x2d   : > { %971 = vperm.xlu0 %1495, %v913_v32  }
  0x2e   : > { %986 = vperm.xlu1 %1496, %v916_v33  }
  0x2f   : > { %1438 = vmatmul.mubr.msk.bf16.gmra.mrb[8].mxu0 %vm391_vm0, %v1510_v21  ;;  %1460 = vmatmul.mubr.msk.bf16.gmra.mrb[8].mxu1 %vm391_vm0, %v1511_v22 }
  0x30   : > { %1441 = vmatprep.mubr.msk.bf16.mxu0 %vm391_vm0, %v1512_v23  ;;  %1463 = vmatprep.mubr.msk.bf16.mxu1 %vm391_vm0, %v1513_v24 }
  0x31   : > { %981 = vperm.xlu0 %1495, %v915_v34  }
  0x32   : > { %996 = vperm.xlu1 %1496, %v918_v35  }
  0x35   : > { %991 = vperm.xlu0 %1495, %v917_v36  }
  0x37   : > { %1442 = vmatmul.mubr.msk.bf16.gmra.mrb[12].mxu0 %vm391_vm0, %v1514_v29  ;;  %1464 = vmatmul.mubr.msk.bf16.gmra.mrb[12].mxu1 %vm391_vm0, %v1515_v30 }
  0xf2   : > { %v1431_v38 = vpop.f32.mrb[0].mxu0  ;;  %v1453_v39 = vpop.f32.mrb[0].mxu1 }
  0xf3   : > { %v463_v40 = vadd.f32 %v1431_v38, %v1785_v37  ;;  %v737_v41 = vadd.f32 %v1453_v39, %v1785_v37  ;;  %v454_v42 = vpop.f32.mrb[1].mxu0  ;;  %v728_v43 = vpop.f32.mrb[1].mxu1 }
  0xf4   : > { %v455_v44 = vadd.f32 %v1785_v37, %v454_v42  ;;  %v729_v45 = vadd.f32 %v1785_v37, %v728_v43  ;;  %v1432_v46 = vpop.f32.mrb[2].mxu0  ;;  %v1454_v47 = vpop.f32.mrb[2].mxu1 }
  0xf5   : > { %v1255_v48 = vmul.f32 -1.442695, %v463_v40  ;;  %v1303_v49 = vmul.f32 -1.442695, %v737_v41  ;;  %v466_v50 = vadd.f32 %v1432_v46, %v1785_v37  ;;  %v740_v51 = vadd.f32 %v1454_v47, %v1785_v37  ;;  %v457_v52 = vpop.f32.mrb[3].mxu0  ;;  %v731_v53 = vpop.f32.mrb[3].mxu1 }
  0xf6   : > { %v1253_v54 = vmul.f32 -1.442695, %v455_v44  ;;  %v1301_v55 = vmul.f32 -1.442695, %v729_v45  ;;  %v458_v56 = vadd.f32 %v1785_v37, %v457_v52  ;;  %v732_v57 = vadd.f32 %v1785_v37, %v731_v53 }
  0xf7   : > { %1516 = vpow2.f32 %v1255_v48  ;;  %v1256_v58 = vmul.f32 -1.442695, %v466_v50  ;;  %v1304_v59 = vmul.f32 -1.442695, %v740_v51 }
  0xf8   : > { %1518 = vpow2.f32 %v1303_v49  ;;  %v1254_v60 = vmul.f32 -1.442695, %v458_v56  ;;  %v1302_v61 = vmul.f32 -1.442695, %v732_v57 }
  0xf9   : > { %1520 = vpow2.f32 %v1253_v54 }
  0xfa   : > { %1522 = vpow2.f32 %v1301_v55  ;;  %v1435_v62 = vpop.f32.mrb[4].mxu0  ;;  %v1457_v63 = vpop.f32.mrb[4].mxu1 }
  0xfb   : > { %1524 = vpow2.f32 %v1256_v58  ;;  %v479_v0 = vadd.f32 %v1435_v62, %v1785_v37  ;;  %v753_v1 = vadd.f32 %v1457_v63, %v1785_v37  ;;  %v470_v2 = vpop.f32.mrb[5].mxu0  ;;  %v744_v3 = vpop.f32.mrb[5].mxu1 }
  0xfc   : > { %1526 = vpow2.f32 %v1304_v59  ;;  %v471_v4 = vadd.f32 %v1785_v37, %v470_v2  ;;  %v745_v5 = vadd.f32 %v1785_v37, %v744_v3  ;;  %v1436_v6 = vpop.f32.mrb[6].mxu0  ;;  %v1458_v7 = vpop.f32.mrb[6].mxu1 }
  0xfd   : > { %1528 = vpow2.f32 %v1254_v60  ;;  %v1259_v8 = vmul.f32 -1.442695, %v479_v0  ;;  %v1307_v9 = vmul.f32 -1.442695, %v753_v1  ;;  %v482_v10 = vadd.f32 %v1436_v6, %v1785_v37  ;;  %v473_v11 = vpop.f32.mrb[7].mxu0  ;;  %v747_v12 = vpop.f32.mrb[7].mxu1 }
  0xfe   : > { %1530 = vpow2.f32 %v1302_v61  ;;  %v1257_v13 = vmul.f32 -1.442695, %v471_v4  ;;  %v1305_v14 = vmul.f32 -1.442695, %v745_v5  ;;  %v756_v42 = vadd.f32 %v1458_v7, %v1785_v37  ;;  %v932_v5 = vpop.permute.xlu1 %931 }
  0xff   : > { %1532 = vpow2.f32 %v1259_v8  ;;  %v1260_v15 = vmul.f32 -1.442695, %v482_v10  ;;  %v474_v45 = vadd.f32 %v1785_v37, %v473_v11  ;;  %v748_v49 = vadd.f32 %v1785_v37, %v747_v12 }
 0x100   : > { %1534 = vpow2.f32 %v1307_v9  ;;  %v1308_v59 = vmul.f32 -1.442695, %v756_v42 }
 0x101   : > { %v1517_v16 = vpop.eup %1516  ;;  %1536 = vpow2.f32 %v1257_v13  ;;  %v1258_v1 = vmul.f32 -1.442695, %v474_v45  ;;  %v1306_v6 = vmul.f32 -1.442695, %v748_v49  ;;  %v922_v13 = vpop.permute.xlu0 %921 }
 0x102   : > { %v1519_v17 = vpop.eup %1518  ;;  %v567_v18 = vadd.f32 1.0, %v1517_v16  ;;  %1538 = vpow2.f32 %v1305_v14  ;;  %v1439_v19 = vpop.f32.mrb[8].mxu0 }
 0x103   : > { %v1461_v20 = vpop.f32.mrb[8].mxu1  ;;  %v1521_v21 = vpop.eup %1520  ;;  %v841_v22 = vadd.f32 1.0, %v1519_v17  ;;  %1540 = vpow2.f32 %v1260_v15  ;;  %v495_v54 = vadd.f32 %v1439_v19, %v1785_v37 }
 0x104   : > { %v486_v23 = vpop.f32.mrb[9].mxu0  ;;  %v760_v24 = vpop.f32.mrb[9].mxu1  ;;  %1542 = vrcp.f32 %v567_v18  ;;  %v565_v26 = vadd.f32 1.0, %v1521_v21  ;;  %v769_v60 = vadd.f32 %v1461_v20, %v1785_v37 }
 0x105   : > { %v1523_v25 = vpop.eup %1522  ;;  %v1440_v27 = vpop.f32.mrb[10].mxu0  ;;  %1544 = vrcp.f32 %v841_v22  ;;  %v487_v2 = vadd.f32 %v1785_v37, %v486_v23  ;;  %v761_v7 = vadd.f32 %v1785_v37, %v760_v24  ;;  %v1263_v10 = vmul.f32 -1.442695, %v495_v54 }
 0x106   : > { %v1800_v28 = vpop.f32.mrb[10].mxu1  ;;  %v1525_v29 = vpop.eup %1524  ;;  %v839_v30 = vadd.f32 1.0, %v1523_v25  ;;  %1546 = vrcp.f32 %v565_v26  ;;  %v498_v11 = vadd.f32 %v1440_v27, %v1785_v37  ;;  %v1311_v14 = vmul.f32 -1.442695, %v769_v60 }
 0x107   : > { %v489_v31 = vpop.f32.mrb[11].mxu0  ;;  %v1527_v32 = vpop.eup %1526  ;;  %v568_v33 = vadd.f32 1.0, %v1525_v29  ;;  %v772_v15 = vadd.f32 %v1800_v28, %v1785_v37  ;;  %v1261_v19 = vmul.f32 -1.442695, %v487_v2  ;;  %v1309_v21 = vmul.f32 -1.442695, %v761_v7 }
 0x108   : > { %v1802_v34 = vpop.f32.mrb[11].mxu1  ;;  %v1529_v35 = vpop.eup %1528  ;;  %1548 = vrcp.f32 %v839_v30  ;;  %v842_v36 = vadd.f32 1.0, %v1527_v32  ;;  %v490_v16 = vadd.f32 %v1785_v37, %v489_v31  ;;  %v1264_v26 = vmul.f32 -1.442695, %v498_v11 }
 0x109   : > { %v1531_v38 = vpop.eup %1530  ;;  %1550 = vrcp.f32 %v568_v33  ;;  %v566_v39 = vadd.f32 1.0, %v1529_v35  ;;  %v764_v22 = vadd.f32 %v1785_v37, %v1802_v34  ;;  %v937_v28 = vpop.permute.xlu1 %936  ;;  %v1312_v29 = vmul.f32 -1.442695, %v772_v15 }
 0x10a   : > { %v1533_v40 = vpop.eup %1532  ;;  %1552 = vrcp.f32 %v842_v36  ;;  %v840_v41 = vadd.f32 1.0, %v1531_v38  ;;  %v1443_v46 = vpop.f32.mrb[12].mxu0  ;;  %v1262_v30 = vmul.f32 -1.442695, %v490_v16 }
 0x10b   : > { %v1535_v43 = vpop.eup %1534  ;;  %1554 = vrcp.f32 %v566_v39  ;;  %v571_v44 = vadd.f32 1.0, %v1533_v40  ;;  %v1465_v50 = vpop.f32.mrb[12].mxu1  ;;  %v511_v23 = vadd.f32 %v1443_v46, %v1785_v37  ;;  %v1310_v40 = vmul.f32 -1.442695, %v764_v22 }
 0x10c   : > { %v1537_v47 = vpop.eup %1536  ;;  %1556 = vrcp.f32 %v840_v41  ;;  %v845_v48 = vadd.f32 1.0, %v1535_v43  ;;  %v1807_v51 = vpop.f32.mrb[13].mxu0  ;;  %v785_v31 = vadd.f32 %v1465_v50, %v1785_v37 }
 0x10d   : > { %v1539_v52 = vpop.eup %1538  ;;  %1558 = vrcp.f32 %v571_v44  ;;  %v569_v53 = vadd.f32 1.0, %v1537_v47  ;;  %v1810_v55 = vpop.f32.mrb[13].mxu1  ;;  %v1267_v41 = vmul.f32 -1.442695, %v511_v23 }
 0x10e   : > { %v1812_v56 = vpop.f32.mrb[14].mxu0  ;;  %v1541_v57 = vpop.eup %1540  ;;  %1560 = vrcp.f32 %v845_v48  ;;  %v843_v58 = vadd.f32 1.0, %v1539_v52  ;;  %v1315_v47 = vmul.f32 -1.442695, %v785_v31  ;;  %v777_v15 = vadd.f32 %v1785_v37, %v1810_v55 }
 0x10f   : > { %v1815_v61 = vpop.f32.mrb[14].mxu1  ;;  %v1817_v62 = vpop.f32.mrb[15].mxu0  ;;  %1562 = vrcp.f32 %v569_v53  ;;  %v572_v0 = vadd.f32 1.0, %v1541_v57 }
 0x110   : > { %v1543_v63 = vpop.eup %1542  ;;  %v1820_v3 = vpop.f32.mrb[15].mxu1  ;;  %1564 = vrcp.f32 %v843_v58  ;;  %v506_v23 = vadd.f32 %v1785_v37, %v1817_v62 }
 0x111   : > { %v1545_v4 = vpop.eup %1544  ;;  %1566 = vrcp.f32 %v572_v0  ;;  %v927_v38 = vpop.permute.xlu0 %926 }
 0x112   : > { %v1547_v8 = vpop.eup %1546  ;;  %v889_v9 = vmul.f32 %v1545_v4, %v1543_v63  ;;  %1568 = vpow2.f32 %v1308_v59  ;;  %v947_v2 = vpop.permute.xlu1 %946 }
 0x113   : > { %v1549_v12 = vpop.eup %1548  ;;  %1570 = vpow2.f32 %v1258_v1 }
 0x114   : > { %v1551_v17 = vpop.eup %1550  ;;  %v887_v18 = vmul.f32 %v1549_v12, %v1547_v8  ;;  %1572 = vpow2.f32 %v1306_v6  ;;  %v1001_v33 = vmul.f32 %v932_v5, %v889_v9  ;;  %v503_v12 = vadd.f32 %v1785_v37, %v1807_v51 }
 0x115   : > { %v1553_v20 = vpop.eup %1552  ;;  %1574 = vpow2.f32 %v1263_v10  ;;  %v942_v4 = vpop.permute.xlu0 %941  ;;  %v788_v51 = vadd.f32 %v1815_v61, %v1785_v37 }
 0x116   : > { %v1555_v24 = vpop.eup %1554  ;;  %v890_v25 = vmul.f32 %v1553_v20, %v1551_v17  ;;  %1576 = vpow2.f32 %v1311_v14  ;;  %v999_v39 = vmul.f32 %v922_v13, %v887_v18  ;;  %v514_v18 = vadd.f32 %v1812_v56, %v1785_v37  ;;  %v957_v20 = vpop.permute.xlu1 %956 }
 0x117   : > { %v1557_v27 = vpop.eup %1556  ;;  %1578 = vpow2.f32 %v1261_v19  ;;  %v780_v56 = vadd.f32 %v1785_v37, %v1820_v3  ;;  %v1316_v61 = vmul.f32 -1.442695, %v788_v51 }
 0x118   : > { %v1559_v32 = vpop.eup %1558  ;;  %v1002_v35 = vmul.f32 %v937_v28, %v890_v25  ;;  %v888_v36 = vmul.f32 %v1557_v27, %v1555_v24  ;;  %1580 = vpow2.f32 %v1309_v21  ;;  %v1265_v25 = vmul.f32 -1.442695, %v503_v12 }
 0x119   : > { %v1561_v34 = vpop.eup %1560  ;;  %1582 = vpow2.f32 %v1264_v26  ;;  %v952_v21 = vpop.permute.xlu0 %951  ;;  %v1313_v28 = vmul.f32 -1.442695, %v777_v15  ;;  %v1268_v31 = vmul.f32 -1.442695, %v514_v18  ;;  %v1314_v3 = vmul.f32 -1.442695, %v780_v56 }
 0x11a   : > { %v1563_v42 = vpop.eup %1562  ;;  %v1362_v43 = vpack.c.bf16 %v1002_v35, %v1001_v33  ;;  %v1000_v44 = vmul.f32 %v927_v38, %v888_v36  ;;  %v1837_v45 = vmul.f32 %v1561_v34, %v1559_v32  ;;  %1584 = vpow2.f32 %v1312_v29 }
 0x11b   : > { %v1565_v46 = vpop.eup %1564  ;;  %1586 = vpow2.f32 %v1262_v30  ;;  %v1266_v33 = vmul.f32 -1.442695, %v506_v23 }
 0x11c   : > { %v1567_v48 = vpop.eup %1566  ;;  %1394 = vst [vmem:[%s1835_s10 + $0x8] sm:$0xff] %v1362_v43   ;;  %v1357_v49 = vpack.c.bf16 %v1000_v44, %v999_v39  ;;  %v1840_v50 = vmul.f32 %v1565_v46, %v1563_v42  ;;  %1588 = vpow2.f32 %v1310_v40  ;;  %v1005_v34 = vmul.f32 %v952_v21, %v1837_v45  ;;  %v967_v40 = vpop.permute.xlu1 %966 }
 0x11d   : > { %v1569_v52 = vpop.eup %1568  ;;  %1590 = vpow2.f32 %v1267_v41  ;;  %v962_v37 = vpop.permute.xlu0 %961 }
 0x11e   : > { %v1571_v53 = vpop.eup %1570  ;;  %1358 = vst [vmem:[%s1835_s10] sm:$0xff] %v1357_v49   ;;  %v846_v54 = vadd.f32 1.0, %v1569_v52  ;;  %1592 = vpow2.f32 %v1315_v47  ;;  %v1003_v39 = vmul.f32 %v942_v4, %v1840_v50 }
 0x11f   : > { %v1573_v57 = vpop.eup %1572  ;;  %v570_v58 = vadd.f32 1.0, %v1571_v53 }
 0x120   : > { %v1575_v59 = vpop.eup %1574  ;;  %1594 = vrcp.f32 %v846_v54  ;;  %v844_v60 = vadd.f32 1.0, %v1573_v57  ;;  %v977_v54 = vpop.permute.xlu1 %976 }
 0x121   : > { %v1577_v63 = vpop.eup %1576  ;;  %1596 = vrcp.f32 %v570_v58  ;;  %v575_v0 = vadd.f32 1.0, %v1575_v59  ;;  %v972_v57 = vpop.permute.xlu0 %971 }
 0x122   : > { %v1579_v1 = vpop.eup %1578  ;;  %1598 = vrcp.f32 %v844_v60  ;;  %v849_v5 = vadd.f32 1.0, %v1577_v63 }
 0x123   : > { %v1581_v6 = vpop.eup %1580  ;;  %1600 = vrcp.f32 %v575_v0  ;;  %v573_v7 = vadd.f32 1.0, %v1579_v1 }
 0x124   : > { %v1583_v8 = vpop.eup %1582  ;;  %1602 = vrcp.f32 %v849_v5  ;;  %v847_v9 = vadd.f32 1.0, %v1581_v6 }
 0x125   : > { %v1585_v10 = vpop.eup %1584  ;;  %1604 = vrcp.f32 %v573_v7  ;;  %v576_v11 = vadd.f32 1.0, %v1583_v8 }
 0x126   : > { %v1587_v13 = vpop.eup %1586  ;;  %1606 = vrcp.f32 %v847_v9  ;;  %v850_v14 = vadd.f32 1.0, %v1585_v10 }
 0x127   : > { %v1589_v16 = vpop.eup %1588  ;;  %1608 = vrcp.f32 %v576_v11  ;;  %v574_v17 = vadd.f32 1.0, %v1587_v13 }
 0x128   : > { %v1591_v19 = vpop.eup %1590  ;;  %1610 = vrcp.f32 %v850_v14  ;;  %v848_v22 = vadd.f32 1.0, %v1589_v16 }
 0x129   : > { %v1593_v24 = vpop.eup %1592  ;;  %1612 = vrcp.f32 %v574_v17  ;;  %v579_v55 = vadd.f32 1.0, %v1591_v19  ;;  %v987_v19 = vpop.permute.xlu1 %986 }
 0x12a   : > { %v1595_v26 = vpop.eup %1594  ;;  %1614 = vrcp.f32 %v848_v22  ;;  %v853_v27 = vadd.f32 1.0, %v1593_v24 }
 0x12b   : > { %v1597_v29 = vpop.eup %1596  ;;  %v894_v30 = vmul.f32 %v1595_v26, %v1567_v48  ;;  %1616 = vrcp.f32 %v579_v55 }
 0x12c   : > { %v1599_v32 = vpop.eup %1598  ;;  %1618 = vrcp.f32 %v853_v27 }
 0x12d   : > { %v1601_v62 = vpop.eup %1600  ;;  %v892_v35 = vmul.f32 %v1599_v32, %v1597_v29  ;;  %v1006_v36 = vmul.f32 %v957_v20, %v894_v30  ;;  %1620 = vpow2.f32 %v1265_v25  ;;  %v982_v20 = vpop.permute.xlu0 %981 }
 0x12e   : > { %v1603_v38 = vpop.eup %1602  ;;  %1622 = vpow2.f32 %v1313_v28  ;;  %v997_v27 = vpop.permute.xlu1 %996 }
 0x12f   : > { %v1605_v41 = vpop.eup %1604  ;;  %v1004_v42 = vmul.f32 %v947_v2, %v892_v35  ;;  %v1372_v43 = vpack.c.bf16 %v1006_v36, %v1005_v34  ;;  %v897_v44 = vmul.f32 %v1603_v38, %v1601_v62  ;;  %1624 = vpow2.f32 %v1268_v31 }
 0x130   : > { %v1607_v46 = vpop.eup %1606  ;;  %1626 = vpow2.f32 %v1316_v61 }
 0x131   : > { %v1609_v47 = vpop.eup %1608  ;;  %v1367_v48 = vpack.c.bf16 %v1004_v42, %v1003_v39  ;;  %1396 = vst [vmem:[%s1835_s10 + $0x18] sm:$0xff] %v1372_v43   ;;  %v895_v45 = vmul.f32 %v1607_v46, %v1605_v41  ;;  %1628 = vpow2.f32 %v1266_v33  ;;  %v1009_v63 = vmul.f32 %v972_v57, %v897_v44  ;;  %v992_v28 = vpop.permute.xlu0 %991 }
 0x132   : > { %v1611_v49 = vpop.eup %1610  ;;  %1630 = vpow2.f32 %v1314_v3 }
 0x133   : > { %v1613_v50 = vpop.eup %1612  ;;  %1395 = vst [vmem:[%s1835_s10 + $0x10] sm:$0xff] %v1367_v48   ;;  %v898_v52 = vmul.f32 %v1611_v49, %v1609_v47  ;;  %v1007_v2 = vmul.f32 %v962_v37, %v895_v45 }
 0x134   : > { %v1615_v53 = vpop.eup %1614 }
 0x135   : > { %v1617_v58 = vpop.eup %1616  ;;  %v896_v59 = vmul.f32 %v1615_v53, %v1613_v50  ;;  %v1010_v60 = vmul.f32 %v977_v54, %v898_v52 }
 0x136   : > { %v1619_v0 = vpop.eup %1618 }
 0x137   : > { %v1621_v1 = vpop.eup %1620  ;;  %v1008_v4 = vmul.f32 %v967_v40, %v896_v59  ;;  %v1382_v5 = vpack.c.bf16 %v1010_v60, %v1009_v63  ;;  %v901_v6 = vmul.f32 %v1619_v0, %v1617_v58 }
 0x138   : > { %v1623_v7 = vpop.eup %1622  ;;  %v577_v8 = vadd.f32 1.0, %v1621_v1 }
 0x139   : > { %v1625_v9 = vpop.eup %1624  ;;  %v1377_v10 = vpack.c.bf16 %v1008_v4, %v1007_v2  ;;  %1398 = vst [vmem:[%s1835_s10 + $0x28] sm:$0xff] %v1382_v5   ;;  %v851_v11 = vadd.f32 1.0, %v1623_v7  ;;  %v1013_v30 = vmul.f32 %v992_v28, %v901_v6 }
 0x13a   : > { %v1627_v12 = vpop.eup %1626  ;;  %1632 = vrcp.f32 %v577_v8  ;;  %v580_v13 = vadd.f32 1.0, %v1625_v9 }
 0x13b   : > { %v1629_v14 = vpop.eup %1628  ;;  %1397 = vst [vmem:[%s1835_s10 + $0x20] sm:$0xff] %v1377_v10   ;;  %1634 = vrcp.f32 %v851_v11  ;;  %v854_v15 = vadd.f32 1.0, %v1627_v12 }
 0x13c   : > { %v1631_v16 = vpop.eup %1630  ;;  %1636 = vrcp.f32 %v580_v13  ;;  %v578_v17 = vadd.f32 1.0, %v1629_v14 }
 0x13d   : > { %1638 = vrcp.f32 %v854_v15  ;;  %v852_v18 = vadd.f32 1.0, %v1631_v16 }
 0x13e   : > { %1640 = vrcp.f32 %v578_v17 }
 0x13f   : > { %1642 = vrcp.f32 %v852_v18 }
 0x144   : > { %v1633_v21 = vpop.eup %1632 }
 0x145   : > { %v1635_v22 = vpop.eup %1634 }
 0x146   : > { %v1637_v51 = vpop.eup %1636  ;;  %v899_v23 = vmul.f32 %v1635_v22, %v1633_v21 }
 0x147   : > { %v1639_v24 = vpop.eup %1638 }
 0x148   : > { %v1641_v55 = vpop.eup %1640  ;;  %v902_v25 = vmul.f32 %v1639_v24, %v1637_v51  ;;  %v1011_v31 = vmul.f32 %v982_v20, %v899_v23 }
 0x149   : > { %v1643_v26 = vpop.eup %1642 }
 0x14a   : > { %v900_v56 = vmul.f32 %v1643_v26, %v1641_v55  ;;  %v1014_v29 = vmul.f32 %v997_v27, %v902_v25 }
 0x14c   : > { %v1012_v32 = vmul.f32 %v987_v19, %v900_v56  ;;  %v1392_v61 = vpack.c.bf16 %v1014_v29, %v1013_v30 }
 0x14e   : > { %v1387_v33 = vpack.c.bf16 %v1012_v32, %v1011_v31  ;;  %1400 = vst [vmem:[%s1835_s10 + $0x38] sm:$0xff] %v1392_v61  }
 0x150   : > { %1399 = vst [vmem:[%s1835_s10 + $0x30] sm:$0xff] %v1387_v33  }
 0x151 PF: > { %s14_s17 = sadd.s32 1, %s1666_s17   ;;  %s1877_s15 = smov %s1662_s16 }
 0x152   : > { %p11_p5 = scmp.ge.s32.totalorder %s14_s17, 4   ;;  %s1878_s16 = smov %s1880_s18 }
 0x154   :  { %13 = sbr.rel (!%p11_p5) target bundleno = 2 (0x2), region = 76 }

</bundles_post_ra>
